<compile_context>
chip_gen: v7x
topology: tpu7x:2x2x1
jax: 0.10.0
libtpu: 0.0.40
codegen_flags: <defaults>
</compile_context>

<pallas_src>
import numpy as np
import jax
import jax.numpy as jnp
from jax.experimental import pallas as pl
from jax.experimental.pallas import tpu as pltpu

SIZE_OI, SIZE_G, SIZE_I, SIZE_Z = 280, 70, 70, 5
OUT_W = 2 * SIZE_OI + 3 * SIZE_Z      # 575 = recon1 | recon2 | mu | logvar | z


def _round_up(x, m):
    return ((x + m - 1) // m) * m


def vae_kernel(x1_ref, x2_ref, eps_ref,
               wi0_ref, bi0_ref, wi1_ref, bi1_ref,
               wga_ref, wgb_ref, bg_ref,
               wmlv_ref, bmlv_ref,
               wgo_ref, bgo_ref,
               wout_ref, bout_ref,
               out_ref):
    f32 = jnp.float32
    bf16 = jnp.bfloat16

    # MXU operands in bf16, accumulate in f32, elementwise math in f32.
    x1 = x1_ref[...].astype(bf16)
    x2 = x2_ref[...].astype(bf16)

    # individual input layers (one each) + ReLU
    h1 = jnp.maximum(
        jnp.dot(x1, wi0_ref[...], preferred_element_type=f32) + bi0_ref[...], 0.0)
    h2 = jnp.maximum(
        jnp.dot(x2, wi1_ref[...], preferred_element_type=f32) + bi1_ref[...], 0.0)

    # grouped input layer: cat([h1, h2], 1) @ Wg == h1 @ Wg_top + h2 @ Wg_bot
    g = jnp.maximum(
        jnp.dot(h1.astype(bf16), wga_ref[...], preferred_element_type=f32)
        + jnp.dot(h2.astype(bf16), wgb_ref[...], preferred_element_type=f32)
        + bg_ref[...], 0.0)

    # fused latent heads: one (size_g, 2*Z) matmul, slice mu / logvar
    mulv = jnp.dot(g.astype(bf16), wmlv_ref[...],
                   preferred_element_type=f32) + bmlv_ref[...]
    mu = mulv[:, :SIZE_Z]
    lv = mulv[:, SIZE_Z:]

    # reparameterize (eps supplied from outside, deterministic randn); f32 math,
    # exp lands on the EUP slot.
    z = mu + eps_ref[...] * jnp.exp(0.5 * lv)

    # grouped output layer + ReLU
    d = jnp.maximum(
        jnp.dot(z.astype(bf16), wgo_ref[...], preferred_element_type=f32)
        + bgo_ref[...], 0.0)

    # fused individual output heads: one (size_g, 2*size_oi) matmul
    recon = (jnp.dot(d.astype(bf16), wout_ref[...], preferred_element_type=f32)
             + bout_ref[...])

    # single lane-dense writeback stream: [recon1 | recon2 | mu | logvar | z]
    out_ref[...] = jnp.concatenate([recon, mulv, z], axis=1)


def init_linear(key, fan_in, fan_out):
    """PyTorch nn.Linear default init: U(-1/sqrt(fan_in), 1/sqrt(fan_in))."""
    k = 1.0 / np.sqrt(fan_in)
    kw, kb = jax.random.split(key)
    W = jax.random.uniform(kw, (fan_out, fan_in), jnp.float32, -k, k)  # torch layout (out, in)
    b = jax.random.uniform(kb, (fan_out,), jnp.float32, -k, k)
    return W, b


def make_params(seed=42):
    """Torch-layout parameters: W (out, in), b (out,)."""
    keys = jax.random.split(jax.random.PRNGKey(seed), 8)
    names = ["i0", "i1", "g", "mu", "lv", "go", "o0", "o1"]
    dims = [(SIZE_OI, SIZE_I), (SIZE_OI, SIZE_I), (2 * SIZE_I, SIZE_G),
            (SIZE_G, SIZE_Z), (SIZE_G, SIZE_Z), (SIZE_Z, SIZE_G),
            (SIZE_G, SIZE_OI), (SIZE_G, SIZE_OI)]
    params = {}
    for k, n, (fi, fo) in zip(keys, names, dims):
        W, b = init_linear(k, fi, fo)
        params[f"W{n}"] = W
        params[f"b{n}"] = b
    return params


def pack_kernel_params(params):
    """Kernel-side layout: bf16 (in, out) weights, f32 (1, out) biases, fused heads."""
    bf16 = jnp.bfloat16
    WgT = params["Wg"].T                                                 # (2*size_i, size_g)
    wmlv = jnp.concatenate([params["Wmu"].T, params["Wlv"].T], axis=1)   # (size_g, 2*Z)
    bmlv = jnp.concatenate([params["bmu"], params["blv"]])[None, :]
    wout = jnp.concatenate([params["Wo0"].T, params["Wo1"].T], axis=1)   # (size_g, 2*size_oi)
    bout = jnp.concatenate([params["bo0"], params["bo1"]])[None, :]
    return [
        params["Wi0"].T.astype(bf16), params["bi0"][None, :],
        params["Wi1"].T.astype(bf16), params["bi1"][None, :],
        WgT[:SIZE_I].astype(bf16), WgT[SIZE_I:].astype(bf16), params["bg"][None, :],
        wmlv.astype(bf16), bmlv,
        params["Wgo"].T.astype(bf16), params["bgo"][None, :],
        wout.astype(bf16), bout,
    ]


def vae_mimo_dense_forward(x1, x2, eps, params, *, tb=1024,
                           vmem_limit_bytes=40 * 1024 * 1024,
                           split_outputs=True):
    """Pallas forward. x1, x2: (B, 280); eps: (B, 5).

    If split_outputs=False, returns the fused (B, 575) slab
    [recon1 | recon2 | mu | logvar | z] to avoid wrapper-side slice copies.
    """
    x1 = x1.reshape(-1, SIZE_OI).astype(jnp.float32)
    x2 = x2.reshape(-1, SIZE_OI).astype(jnp.float32)
    eps = eps.reshape(-1, SIZE_Z).astype(jnp.float32)
    B = x1.shape[0]

    # Batch tile: multiple of 8, at most ceil(B/2) (rounded up to 8) so the
    # "parallel" grid axis has >= 2 steps for the v7x megacore.  No padding of
    # the inputs; Pallas masks the partial last block.
    if B <= 8:
        tb_eff = B                                   # single block == full batch
    else:
        tb_req = _round_up(max(tb, 8), 8)
        half = _round_up(-(-B // 2), 8)              # ceil(B/2) rounded to 8
        tb_eff = max(8, min(tb_req, half))
    grid = (pl.cdiv(B, tb_eff),)

    kparams = pack_kernel_params(params)

    def batch_spec(n):
        return pl.BlockSpec((tb_eff, n), lambda i: (i, 0))

    def bcast_spec(shape):
        return pl.BlockSpec(shape, lambda i: (0,) * len(shape))

    in_specs = ([batch_spec(SIZE_OI), batch_spec(SIZE_OI), batch_spec(SIZE_Z)]
                + [bcast_spec(p.shape) for p in kparams])

    out_spec = batch_spec(OUT_W)
    out_shape = jax.ShapeDtypeStruct((B, OUT_W), jnp.float32)

    # Advisory cost estimate (per-row matmul MACs * 2, exp per latent dim,
    # input + output HBM traffic plus one pass over the weights).
    macs_per_row = (2 * SIZE_OI * SIZE_I + 2 * SIZE_I * SIZE_G
                    + SIZE_G * 2 * SIZE_Z + SIZE_Z * SIZE_G
                    + SIZE_G * 2 * SIZE_OI)
    weight_bytes = int(sum(int(np.prod(p.shape)) * p.dtype.itemsize for p in kparams))
    cost = pl.CostEstimate(
        flops=2 * macs_per_row * B,
        transcendentals=SIZE_Z * B,
        bytes_accessed=(2 * SIZE_OI + SIZE_Z + OUT_W) * 4 * B + weight_bytes,
    )

    fused = pl.pallas_call(
        vae_kernel,
        out_shape=out_shape,
        grid_spec=pltpu.PrefetchScalarGridSpec(
            num_scalar_prefetch=0,
            grid=grid,
            in_specs=in_specs,
            out_specs=out_spec,
        ),
        compiler_params=pltpu.CompilerParams(
            dimension_semantics=("parallel",),
            vmem_limit_bytes=vmem_limit_bytes),
        cost_estimate=cost,
    )(x1, x2, eps, *kparams)

    if not split_outputs:
        return fused

    r1 = fused[:, :SIZE_OI]
    r2 = fused[:, SIZE_OI:2 * SIZE_OI]
    mu = fused[:, 2 * SIZE_OI:2 * SIZE_OI + SIZE_Z]
    lv = fused[:, 2 * SIZE_OI + SIZE_Z:2 * SIZE_OI + 2 * SIZE_Z]
    z = fused[:, 2 * SIZE_OI + 2 * SIZE_Z:]
    return (r1, r2), mu, lv, z


def reference_forward(x1, x2, eps, params):
    """Pure-JAX reference of the PyTorch forward (for validation)."""
    x1 = x1.reshape(-1, SIZE_OI)
    x2 = x2.reshape(-1, SIZE_OI)
    h1 = jax.nn.relu(x1 @ params["Wi0"].T + params["bi0"])
    h2 = jax.nn.relu(x2 @ params["Wi1"].T + params["bi1"])
    h = jnp.concatenate([h1, h2], axis=1)
    g = jax.nn.relu(h @ params["Wg"].T + params["bg"])
    mu = g @ params["Wmu"].T + params["bmu"]
    lv = g @ params["Wlv"].T + params["blv"]
    z = mu + eps * jnp.exp(0.5 * lv)
    d = jax.nn.relu(z @ params["Wgo"].T + params["bgo"])
    r1 = d @ params["Wo0"].T + params["bo0"]
    r2 = d @ params["Wo1"].T + params["bo1"]
    return (r1, r2), mu, lv, z


if __name__ == "__main__":
    B = 16
    key = jax.random.PRNGKey(0)
    k1, k2, keps = jax.random.split(key, 3)
    x1 = jax.random.normal(k1, (B, SIZE_OI), jnp.float32)
    x2 = jax.random.normal(k2, (B, SIZE_OI), jnp.float32)
    # torch.randn_like(std) in reparameterize -> deterministic eps drawn here.
    eps = jax.random.normal(keps, (B, SIZE_Z), jnp.float32)

    params = make_params(seed=42)

    (r1, r2), mu, lv, z = vae_mimo_dense_forward(x1, x2, eps, params)
    jax.block_until_ready((r1, r2, mu, lv, z))

    (r1_ref, r2_ref), mu_ref, lv_ref, z_ref = reference_forward(x1, x2, eps, params)
    # bf16 MXU operands in the kernel -> relaxed tolerance vs f32 reference.
    tol = dict(rtol=3e-2, atol=3e-2)
    np.testing.assert_allclose(np.asarray(r1), np.asarray(r1_ref), **tol)
    np.testing.assert_allclose(np.asarray(r2), np.asarray(r2_ref), **tol)
    np.testing.assert_allclose(np.asarray(mu), np.asarray(mu_ref), **tol)
    np.testing.assert_allclose(np.asarray(lv), np.asarray(lv_ref), **tol)
    np.testing.assert_allclose(np.asarray(z), np.asarray(z_ref), **tol)

    print("KERNEL_OK")
</pallas_src>

<mosaic_0001>
module attributes {stable_mosaic.version = 11 : i64} {
  func.func @vae_kernel(%arg0: i32, %arg1: memref<8x280xf32, #tpu.memory_space<vmem>>, %arg2: memref<8x280xf32, #tpu.memory_space<vmem>>, %arg3: memref<8x5xf32, #tpu.memory_space<vmem>>, %arg4: memref<280x70xbf16, #tpu.memory_space<vmem>>, %arg5: memref<1x70xf32, #tpu.memory_space<vmem>>, %arg6: memref<280x70xbf16, #tpu.memory_space<vmem>>, %arg7: memref<1x70xf32, #tpu.memory_space<vmem>>, %arg8: memref<70x70xbf16, #tpu.memory_space<vmem>>, %arg9: memref<70x70xbf16, #tpu.memory_space<vmem>>, %arg10: memref<1x70xf32, #tpu.memory_space<vmem>>, %arg11: memref<70x10xbf16, #tpu.memory_space<vmem>>, %arg12: memref<1x10xf32, #tpu.memory_space<vmem>>, %arg13: memref<5x70xbf16, #tpu.memory_space<vmem>>, %arg14: memref<1x70xf32, #tpu.memory_space<vmem>>, %arg15: memref<70x560xbf16, #tpu.memory_space<vmem>>, %arg16: memref<1x560xf32, #tpu.memory_space<vmem>>, %arg17: memref<8x575xf32, #tpu.memory_space<vmem>>) attributes {dimension_semantics = [#tpu.dimension_semantics<parallel>], iteration_bounds = array<i64: 2>, scalar_prefetch = 0 : i64, scratch_operands = 0 : i64, tpu.core_type = #tpu.core_type<tc>, window_params = [{transform_indices = @transform_0, window_bounds = array<i64: 8, 280>}, {transform_indices = @transform_1, window_bounds = array<i64: 8, 280>}, {transform_indices = @transform_2, window_bounds = array<i64: 8, 5>}, {pipeline_mode = #tpu.pipeline_mode<synchronous>, transform_indices = @transform_3, window_bounds = array<i64: 280, 70>}, {pipeline_mode = #tpu.pipeline_mode<synchronous>, transform_indices = @transform_4, window_bounds = array<i64: 1, 70>}, {pipeline_mode = #tpu.pipeline_mode<synchronous>, transform_indices = @transform_5, window_bounds = array<i64: 280, 70>}, {pipeline_mode = #tpu.pipeline_mode<synchronous>, transform_indices = @transform_6, window_bounds = array<i64: 1, 70>}, {pipeline_mode = #tpu.pipeline_mode<synchronous>, transform_indices = @transform_7, window_bounds = array<i64: 70, 70>}, {pipeline_mode = #tpu.pipeline_mode<synchronous>, transform_indices = @transform_8, window_bounds = array<i64: 70, 70>}, {pipeline_mode = #tpu.pipeline_mode<synchronous>, transform_indices = @transform_9, window_bounds = array<i64: 1, 70>}, {pipeline_mode = #tpu.pipeline_mode<synchronous>, transform_indices = @transform_10, window_bounds = array<i64: 70, 10>}, {pipeline_mode = #tpu.pipeline_mode<synchronous>, transform_indices = @transform_11, window_bounds = array<i64: 1, 10>}, {pipeline_mode = #tpu.pipeline_mode<synchronous>, transform_indices = @transform_12, window_bounds = array<i64: 5, 70>}, {pipeline_mode = #tpu.pipeline_mode<synchronous>, transform_indices = @transform_13, window_bounds = array<i64: 1, 70>}, {pipeline_mode = #tpu.pipeline_mode<synchronous>, transform_indices = @transform_14, window_bounds = array<i64: 70, 560>}, {pipeline_mode = #tpu.pipeline_mode<synchronous>, transform_indices = @transform_15, window_bounds = array<i64: 1, 560>}, {transform_indices = @transform_16, window_bounds = array<i64: 8, 575>}]} {
    %c0 = arith.constant 0 : index
    %c0_0 = arith.constant 0 : index
    %0 = vector.load %arg1[%c0, %c0_0] : memref<8x280xf32, #tpu.memory_space<vmem>>, vector<8x280xf32>
    %1 = arith.truncf %0 : vector<8x280xf32> to vector<8x280xbf16>
    %c0_1 = arith.constant 0 : index
    %c0_2 = arith.constant 0 : index
    %2 = vector.load %arg2[%c0_1, %c0_2] : memref<8x280xf32, #tpu.memory_space<vmem>>, vector<8x280xf32>
    %3 = arith.truncf %2 : vector<8x280xf32> to vector<8x280xbf16>
    %c0_3 = arith.constant 0 : index
    %c0_4 = arith.constant 0 : index
    %4 = vector.load %arg4[%c0_3, %c0_4] : memref<280x70xbf16, #tpu.memory_space<vmem>>, vector<280x70xbf16>
    %cst = arith.constant dense<0.000000e+00> : vector<8x70xf32>
    %5 = tpu.matmul %1, %4, %cst {dimension_numbers = #tpu.dot_dimension_numbers<[1], [0], [0], [1], [0, 0, 1, 1], [], []>} : vector<8x280xbf16>, vector<280x70xbf16>, vector<8x70xf32> -> vector<8x70xf32>
    %c0_5 = arith.constant 0 : index
    %c0_6 = arith.constant 0 : index
    %6 = vector.load %arg5[%c0_5, %c0_6] : memref<1x70xf32, #tpu.memory_space<vmem>>, vector<1x70xf32>
    %7 = vector.broadcast %6 : vector<1x70xf32> to vector<8x70xf32>
    %8 = arith.addf %5, %7 : vector<8x70xf32>
    %cst_7 = arith.constant 0.000000e+00 : f32
    %9 = vector.broadcast %cst_7 : f32 to vector<8x70xf32>
    %10 = arith.maximumf %8, %9 : vector<8x70xf32>
    %c0_8 = arith.constant 0 : index
    %c0_9 = arith.constant 0 : index
    %11 = vector.load %arg6[%c0_8, %c0_9] : memref<280x70xbf16, #tpu.memory_space<vmem>>, vector<280x70xbf16>
    %cst_10 = arith.constant dense<0.000000e+00> : vector<8x70xf32>
    %12 = tpu.matmul %3, %11, %cst_10 {dimension_numbers = #tpu.dot_dimension_numbers<[1], [0], [0], [1], [0, 0, 1, 1], [], []>} : vector<8x280xbf16>, vector<280x70xbf16>, vector<8x70xf32> -> vector<8x70xf32>
    %c0_11 = arith.constant 0 : index
    %c0_12 = arith.constant 0 : index
    %13 = vector.load %arg7[%c0_11, %c0_12] : memref<1x70xf32, #tpu.memory_space<vmem>>, vector<1x70xf32>
    %14 = vector.broadcast %13 : vector<1x70xf32> to vector<8x70xf32>
    %15 = arith.addf %12, %14 : vector<8x70xf32>
    %cst_13 = arith.constant 0.000000e+00 : f32
    %16 = vector.broadcast %cst_13 : f32 to vector<8x70xf32>
    %17 = arith.maximumf %15, %16 : vector<8x70xf32>
    %18 = arith.truncf %10 : vector<8x70xf32> to vector<8x70xbf16>
    %c0_14 = arith.constant 0 : index
    %c0_15 = arith.constant 0 : index
    %19 = vector.load %arg8[%c0_14, %c0_15] : memref<70x70xbf16, #tpu.memory_space<vmem>>, vector<70x70xbf16>
    %cst_16 = arith.constant dense<0.000000e+00> : vector<8x70xf32>
    %20 = tpu.matmul %18, %19, %cst_16 {dimension_numbers = #tpu.dot_dimension_numbers<[1], [0], [0], [1], [0, 0, 1, 1], [], []>} : vector<8x70xbf16>, vector<70x70xbf16>, vector<8x70xf32> -> vector<8x70xf32>
    %21 = arith.truncf %17 : vector<8x70xf32> to vector<8x70xbf16>
    %c0_17 = arith.constant 0 : index
    %c0_18 = arith.constant 0 : index
    %22 = vector.load %arg9[%c0_17, %c0_18] : memref<70x70xbf16, #tpu.memory_space<vmem>>, vector<70x70xbf16>
    %cst_19 = arith.constant dense<0.000000e+00> : vector<8x70xf32>
    %23 = tpu.matmul %21, %22, %cst_19 {dimension_numbers = #tpu.dot_dimension_numbers<[1], [0], [0], [1], [0, 0, 1, 1], [], []>} : vector<8x70xbf16>, vector<70x70xbf16>, vector<8x70xf32> -> vector<8x70xf32>
    %24 = arith.addf %20, %23 : vector<8x70xf32>
    %c0_20 = arith.constant 0 : index
    %c0_21 = arith.constant 0 : index
    %25 = vector.load %arg10[%c0_20, %c0_21] : memref<1x70xf32, #tpu.memory_space<vmem>>, vector<1x70xf32>
    %26 = vector.broadcast %25 : vector<1x70xf32> to vector<8x70xf32>
    %27 = arith.addf %24, %26 : vector<8x70xf32>
    %cst_22 = arith.constant 0.000000e+00 : f32
    %28 = vector.broadcast %cst_22 : f32 to vector<8x70xf32>
    %29 = arith.maximumf %27, %28 : vector<8x70xf32>
    %30 = arith.truncf %29 : vector<8x70xf32> to vector<8x70xbf16>
    %c0_23 = arith.constant 0 : index
    %c0_24 = arith.constant 0 : index
    %31 = vector.load %arg11[%c0_23, %c0_24] : memref<70x10xbf16, #tpu.memory_space<vmem>>, vector<70x10xbf16>
    %cst_25 = arith.constant dense<0.000000e+00> : vector<8x10xf32>
    %32 = tpu.matmul %30, %31, %cst_25 {dimension_numbers = #tpu.dot_dimension_numbers<[1], [0], [0], [1], [0, 0, 1, 1], [], []>} : vector<8x70xbf16>, vector<70x10xbf16>, vector<8x10xf32> -> vector<8x10xf32>
    %c0_26 = arith.constant 0 : index
    %c0_27 = arith.constant 0 : index
    %33 = vector.load %arg12[%c0_26, %c0_27] : memref<1x10xf32, #tpu.memory_space<vmem>>, vector<1x10xf32>
    %34 = vector.broadcast %33 : vector<1x10xf32> to vector<8x10xf32>
    %35 = arith.addf %32, %34 : vector<8x10xf32>
    %36 = vector.extract_strided_slice %35 {offsets = [0, 0], sizes = [8, 5], strides = [1, 1]} : vector<8x10xf32> to vector<8x5xf32>
    %37 = vector.extract_strided_slice %35 {offsets = [0, 5], sizes = [8, 5], strides = [1, 1]} : vector<8x10xf32> to vector<8x5xf32>
    %c0_28 = arith.constant 0 : index
    %c0_29 = arith.constant 0 : index
    %38 = vector.load %arg3[%c0_28, %c0_29] : memref<8x5xf32, #tpu.memory_space<vmem>>, vector<8x5xf32>
    %cst_30 = arith.constant 5.000000e-01 : f32
    %39 = vector.broadcast %cst_30 : f32 to vector<8x5xf32>
    %40 = arith.mulf %39, %37 : vector<8x5xf32>
    %41 = math.exp %40 : vector<8x5xf32>
    %42 = arith.mulf %38, %41 : vector<8x5xf32>
    %43 = arith.addf %36, %42 : vector<8x5xf32>
    %44 = arith.truncf %43 : vector<8x5xf32> to vector<8x5xbf16>
    %c0_31 = arith.constant 0 : index
    %c0_32 = arith.constant 0 : index
    %45 = vector.load %arg13[%c0_31, %c0_32] : memref<5x70xbf16, #tpu.memory_space<vmem>>, vector<5x70xbf16>
    %cst_33 = arith.constant dense<0.000000e+00> : vector<8x70xf32>
    %46 = tpu.matmul %44, %45, %cst_33 {dimension_numbers = #tpu.dot_dimension_numbers<[1], [0], [0], [1], [0, 0, 1, 1], [], []>} : vector<8x5xbf16>, vector<5x70xbf16>, vector<8x70xf32> -> vector<8x70xf32>
    %c0_34 = arith.constant 0 : index
    %c0_35 = arith.constant 0 : index
    %47 = vector.load %arg14[%c0_34, %c0_35] : memref<1x70xf32, #tpu.memory_space<vmem>>, vector<1x70xf32>
    %48 = vector.broadcast %47 : vector<1x70xf32> to vector<8x70xf32>
    %49 = arith.addf %46, %48 : vector<8x70xf32>
    %cst_36 = arith.constant 0.000000e+00 : f32
    %50 = vector.broadcast %cst_36 : f32 to vector<8x70xf32>
    %51 = arith.maximumf %49, %50 : vector<8x70xf32>
    %52 = arith.truncf %51 : vector<8x70xf32> to vector<8x70xbf16>
    %c0_37 = arith.constant 0 : index
    %c0_38 = arith.constant 0 : index
    %53 = vector.load %arg15[%c0_37, %c0_38] : memref<70x560xbf16, #tpu.memory_space<vmem>>, vector<70x560xbf16>
    %cst_39 = arith.constant dense<0.000000e+00> : vector<8x560xf32>
    %54 = tpu.matmul %52, %53, %cst_39 {dimension_numbers = #tpu.dot_dimension_numbers<[1], [0], [0], [1], [0, 0, 1, 1], [], []>} : vector<8x70xbf16>, vector<70x560xbf16>, vector<8x560xf32> -> vector<8x560xf32>
    %c0_40 = arith.constant 0 : index
    %c0_41 = arith.constant 0 : index
    %55 = vector.load %arg16[%c0_40, %c0_41] : memref<1x560xf32, #tpu.memory_space<vmem>>, vector<1x560xf32>
    %56 = vector.broadcast %55 : vector<1x560xf32> to vector<8x560xf32>
    %57 = arith.addf %54, %56 : vector<8x560xf32>
    %58 = tpu.concatenate %57, %35, %43 in 1 : vector<8x560xf32>, vector<8x10xf32>, vector<8x5xf32> -> vector<8x575xf32>
    %c0_42 = arith.constant 0 : index
    %c0_43 = arith.constant 0 : index
    %59 = vector.load %arg17[%c0_42, %c0_43] : memref<8x575xf32, #tpu.memory_space<vmem>>, vector<8x575xf32>
    tpu.vector_store %arg17[%c0_42, %c0_43], %58 {strides = array<i32>} : memref<8x575xf32, #tpu.memory_space<vmem>>, vector<8x575xf32>,
    return
  }
  func.func @transform_0(%arg0: i32) -> (i32, i32) {
    %c0_i32 = arith.constant 0 : i32
    %c0_i32_0 = arith.constant 0 : i32
    return %arg0, %c0_i32 : i32, i32
  }
  func.func @transform_1(%arg0: i32) -> (i32, i32) {
    %c0_i32 = arith.constant 0 : i32
    %c0_i32_0 = arith.constant 0 : i32
    return %arg0, %c0_i32 : i32, i32
  }
  func.func @transform_2(%arg0: i32) -> (i32, i32) {
    %c0_i32 = arith.constant 0 : i32
    %c0_i32_0 = arith.constant 0 : i32
    return %arg0, %c0_i32 : i32, i32
  }
  func.func @transform_3(%arg0: i32) -> (i32, i32) {
    %c0_i32 = arith.constant 0 : i32
    %c0_i32_0 = arith.constant 0 : i32
    %c0_i32_1 = arith.constant 0 : i32
    return %c0_i32, %c0_i32_0 : i32, i32
  }
  func.func @transform_4(%arg0: i32) -> (i32, i32) {
    %c0_i32 = arith.constant 0 : i32
    %c0_i32_0 = arith.constant 0 : i32
    %c0_i32_1 = arith.constant 0 : i32
    return %c0_i32, %c0_i32_0 : i32, i32
  }
  func.func @transform_5(%arg0: i32) -> (i32, i32) {
    %c0_i32 = arith.constant 0 : i32
    %c0_i32_0 = arith.constant 0 : i32
    %c0_i32_1 = arith.constant 0 : i32
    return %c0_i32, %c0_i32_0 : i32, i32
  }
  func.func @transform_6(%arg0: i32) -> (i32, i32) {
    %c0_i32 = arith.constant 0 : i32
    %c0_i32_0 = arith.constant 0 : i32
    %c0_i32_1 = arith.constant 0 : i32
    return %c0_i32, %c0_i32_0 : i32, i32
  }
  func.func @transform_7(%arg0: i32) -> (i32, i32) {
    %c0_i32 = arith.constant 0 : i32
    %c0_i32_0 = arith.constant 0 : i32
    %c0_i32_1 = arith.constant 0 : i32
    return %c0_i32, %c0_i32_0 : i32, i32
  }
  func.func @transform_8(%arg0: i32) -> (i32, i32) {
    %c0_i32 = arith.constant 0 : i32
    %c0_i32_0 = arith.constant 0 : i32
    %c0_i32_1 = arith.constant 0 : i32
    return %c0_i32, %c0_i32_0 : i32, i32
  }
  func.func @transform_9(%arg0: i32) -> (i32, i32) {
    %c0_i32 = arith.constant 0 : i32
    %c0_i32_0 = arith.constant 0 : i32
    %c0_i32_1 = arith.constant 0 : i32
    return %c0_i32, %c0_i32_0 : i32, i32
  }
  func.func @transform_10(%arg0: i32) -> (i32, i32) {
    %c0_i32 = arith.constant 0 : i32
    %c0_i32_0 = arith.constant 0 : i32
    %c0_i32_1 = arith.constant 0 : i32
    return %c0_i32, %c0_i32_0 : i32, i32
  }
  func.func @transform_11(%arg0: i32) -> (i32, i32) {
    %c0_i32 = arith.constant 0 : i32
    %c0_i32_0 = arith.constant 0 : i32
    %c0_i32_1 = arith.constant 0 : i32
    return %c0_i32, %c0_i32_0 : i32, i32
  }
  func.func @transform_12(%arg0: i32) -> (i32, i32) {
    %c0_i32 = arith.constant 0 : i32
    %c0_i32_0 = arith.constant 0 : i32
    %c0_i32_1 = arith.constant 0 : i32
    return %c0_i32, %c0_i32_0 : i32, i32
  }
  func.func @transform_13(%arg0: i32) -> (i32, i32) {
    %c0_i32 = arith.constant 0 : i32
    %c0_i32_0 = arith.constant 0 : i32
    %c0_i32_1 = arith.constant 0 : i32
    return %c0_i32, %c0_i32_0 : i32, i32
  }
  func.func @transform_14(%arg0: i32) -> (i32, i32) {
    %c0_i32 = arith.constant 0 : i32
    %c0_i32_0 = arith.constant 0 : i32
    %c0_i32_1 = arith.constant 0 : i32
    return %c0_i32, %c0_i32_0 : i32, i32
  }
  func.func @transform_15(%arg0: i32) -> (i32, i32) {
    %c0_i32 = arith.constant 0 : i32
    %c0_i32_0 = arith.constant 0 : i32
    %c0_i32_1 = arith.constant 0 : i32
    return %c0_i32, %c0_i32_0 : i32, i32
  }
  func.func @transform_16(%arg0: i32) -> (i32, i32) {
    %c0_i32 = arith.constant 0 : i32
    %c0_i32_0 = arith.constant 0 : i32
    return %arg0, %c0_i32 : i32, i32
  }
}

</mosaic_0001>

<bundles_post_ra>
// kernel: tpu_custom_call.1
= control target key start
LH: loop header
LB: loop body
LE: loop exit
PB: predicated region body
PF: predicated region fallthrough
CT: control target
= control target key end

     0   :  { %s2777_s0 = inlined_call_operand.vmem [shape: f32[16,280], index: 0, kind: input, shape index: {}]   ;;  %s2778_s1 = inlined_call_operand.vmem [shape: f32[16,280], index: 1, kind: input, shape index: {}]   ;;  %s2779_s2 = inlined_call_operand.vmem [shape: f32[16,5], index: 2, kind: input, shape index: {}]   ;;  %s2780_s3 = inlined_call_operand.vmem [shape: bf16[280,70], index: 3, kind: input, shape index: {}]   ;;  %s2781_s4 = inlined_call_operand.vmem [shape: f32[1,70], index: 4, kind: input, shape index: {}]   ;;  %s2782_s5 = inlined_call_operand.vmem [shape: bf16[280,70], index: 5, kind: input, shape index: {}]   ;;  %s2783_s6 = inlined_call_operand.vmem [shape: f32[1,70], index: 6, kind: input, shape index: {}]   ;;  %s2784_s7 = inlined_call_operand.vmem [shape: bf16[70,70], index: 7, kind: input, shape index: {}]   ;;  %s2785_s8 = inlined_call_operand.vmem [shape: bf16[70,70], index: 8, kind: input, shape index: {}]   ;;  %s2786_s9 = inlined_call_operand.vmem [shape: f32[1,70], index: 9, kind: input, shape index: {}]   ;;  %s2787_s10 = inlined_call_operand.vmem [shape: bf16[70,10], index: 10, kind: input, shape index: {}]   ;;  %s2788_s11 = inlined_call_operand.vmem [shape: f32[1,10], index: 11, kind: input, shape index: {}]   ;;  %s2789_s12 = inlined_call_operand.vmem [shape: bf16[5,70], index: 12, kind: input, shape index: {}]   ;;  %s2790_s13 = inlined_call_operand.vmem [shape: f32[1,70], index: 13, kind: input, shape index: {}]   ;;  %s2791_s14 = inlined_call_operand.vmem [shape: bf16[70,560], index: 14, kind: input, shape index: {}]   ;;  %s2792_s15 = inlined_call_operand.vmem [shape: f32[1,560], index: 15, kind: input, shape index: {}]   ;;  %s2793_s16 = inlined_call_operand.hbm [shape: f32[16,575], index: 16, kind: output, shape index: {}]  }
   0x1   :  { %2801 = sst [smem:[#allocation11_spill]] %s2777_s0 }
   0x2   :  { %2802 = sst [smem:[#allocation12_spill]] %s2778_s1 }
   0x3   :  { %21 = vsyncpa [#allocation3], 0 }
   0x4   :  { %23 = vsyncpa [#allocation3 + $0x1], 0  ;;  %s2353_s21 = smov 0   ;;  %s2355_s22 = smov 0  }
   0x5   :  { %s2357_s23 = smov 0   ;;  %s2359_s24 = smov 0  }
   0x6 LB: > { %2803 = sst [smem:[#allocation5_spill]] %s2246_s21  ;;  %s2374_s25 = sadd.s32 4294967295, %s2258_s24   ;;  %s2258_s24 = sphi %s2359_s24, %s2817_s24   ;;  %s2254_s23 = sphi %s2357_s23, %s2819_s23   ;;  %s2250_s22 = sphi %s2355_s22, %s2821_s22   ;;  %s2246_s21 = sphi %s2353_s21, %s2820_s21  }
   0x7   : > { %2804 = sst [smem:[#allocation6_spill]] %s2254_s23  ;;  %s1805_s26 = sadd.s32 4294967294, %s2258_s24  }
   0x8   : > { %2805 = sst [smem:[#allocation7_spill]] %s2258_s24  ;;  %s2378_s27 = sadd.s32 1, %s2258_s24  }
   0x9   : > { %2806 = sst [smem:[#allocation8_spill]] %s2378_s27  ;;  %s387_s28 = sadd.s32 1, %s2254_s23 }
   0xa   : > { %s384_s29 = ssub.s32 %s2258_s24, %s2378_s27  ;;  %p397_p0 = scmp.ne.s32.totalorder %s2254_s23, %s2250_s22 }
   0xb   : > { %p385_p1 = scmp.eq.s32.totalorder %s384_s29, 0  ;;  %p398_p2 = scmp.eq.s32.totalorder %s2374_s25, 1 }
   0xc   : > { %p403_p3 = scmp.ne.s32.totalorder %s2250_s22, %s2246_s21  ;;  %p404_p4 = scmp.eq.s32.totalorder %s1805_s26, 1 }
   0xd   : > { %s2389_s30 = scalar_select %p385_p1, %s2254_s23, %s387_s28  }
   0xe   : > { %p2391_p5 = por %p398_p2, %p397_p0  ;;  %p2395_p6 = por %p404_p4, %p403_p3 }
   0xf   : > { %2807 = sst [smem:[#allocation9_spill]] %s2389_s30  ;;  %p1808_p7 = scmp.ge.s32.totalorder %s2258_s24, 1 }
  0x10   : > { %s2809_s17 = scalar_select %p2395_p6, 1, 0 }
  0x11   : > { %p484_p8 = scmp.lt.s32.totalorder %s2258_s24, 3 }
  0x12   : > { %2810 = sst [smem:[#allocation10_spill]] %s2809_s17 }
  0x13   : > { %p485_p9 = pnand %p1808_p7, %p484_p8 }
  0x14   : > { %v2110_v0 = vld [vmem:[%s2780_s3 + $0x40] sm:$0xff] (!%p485_p9)   ;;  %v2260_v1 = vmov (!%p485_p9), 0.0   ;;  %vm721_vm0 = vcmask (!%p485_p9), 1043456   ;;  %v2113_v4 = vld [vmem:[%s2780_s3 + $0x48] sm:$0xff] (!%p485_p9)   ;;  %vm2261_vm1 = vmmov (!%p485_p9), 0   ;;  %p543_p10 = scmp.lt.s32.totalorder (!%p485_p9), %s2374_s25, 1 }
  0x15   : > { %488 = sbr.rel (%p485_p9) target bundleno = 1329 (0x531), region = 84  ;;  %1983 = vmatprep.subr.bf16.mxu1 (!%p485_p9), %v2260_v1  ;;  %v2111_v2 = vld [vmem:[%s2780_s3 + $0x80] sm:$0xff] (!%p485_p9)   ;;  %1907 = vmatprep.subr.bf16.mxu0 (!%p485_p9), %v2110_v0  ;;  %v2114_v5 = vld [vmem:[%s2780_s3 + $0x88] ss:$0 sps:$4 sm:$0xff] (!%p485_p9)   ;;  %v2117_v9 = vld [vmem:[%s2780_s3 + $0x50] sm:$0xff] (!%p485_p9)   ;;  %s2811_s30 = sld [smem:[#allocation11_spill]] (!%p485_p9) }
  0x16   : > { %v2112_v3 = vld [vmem:[%s2780_s3] sm:$0xff] (!%p485_p9)   ;;  %1984 = vmatpush3.bf16.msra.mxu1 (!%p485_p9), %v2111_v2  ;;  %1987 = vmatprep.mubr.msk.bf16.mxu1 (!%p485_p9), %vm2261_vm1, %v2260_v1  ;;  %v2115_v6 = vld [vmem:[%s2780_s3 + $0x8] sm:$0xff] (!%p485_p9)   ;;  %v723_v8 = vsel (!%p485_p9), %vm721_vm0, %v2114_v5, 0  ;;  %v2119_v11 = vld [vmem:[%s2780_s3 + $0x10] sm:$0xff] (!%p485_p9)   ;;  %vm717_vm2 = vcmask (!%p485_p9), 195584   ;;  %s2813_s1 = sld [smem:[#allocation12_spill]] (!%p485_p9) }
  0x17   : > { %1908 = vmatpush3.bf16.msra.mxu0 (!%p485_p9), %v2112_v3  ;;  %1985 = vmatprep.subr.bf16.mxu1 (!%p485_p9), %v2260_v1  ;;  %v2116_v7 = vld [vmem:[%s2782_s5 + $0x40] sm:$0xff] (!%p485_p9)   ;;  %v2120_v13 = vld [vmem:[%s2782_s5 + $0x48] sm:$0xff] (!%p485_p9)   ;;  %v2121_v15 = vld [vmem:[%s2780_s3 + $0x58] sm:$0xff] (!%p485_p9)   ;;  %vm1091_vm3 = vcmask (!%p485_p9), 1042432   ;;  %vm1087_vm4 = vcmask (!%p485_p9), 572416   ;;  %vm1330_vm5 = vcmask (!%p485_p9), 1041408  }
  0x18   : > { %1909 = vmatprep.subr.bf16.mxu0 (!%p485_p9), %v2113_v4  ;;  %v2118_v10 = vld [vmem:[%s2782_s5] sm:$0xff] (!%p485_p9)   ;;  %v2122_v16 = vld [vmem:[%s2782_s5 + $0x8] sm:$0xff] (!%p485_p9)   ;;  %v2123_v17 = vld [vmem:[%s2780_s3 + $0x18] sm:$0xff] (!%p485_p9)   ;;  %s2263_s19 = smov (!%p485_p9), 123   ;;  %vm1326_vm6 = vcmask (!%p485_p9), 39936   ;;  %vm1697_vm7 = vcmask (!%p485_p9), 392192  }
  0x19   : > { %v2124_v18 = vld [vmem:[%s2782_s5 + $0x50] sm:$0xff] (!%p485_p9)   ;;  %v2125_v19 = vld [vmem:[%s2780_s3 + $0x60] sm:$0xff] (!%p485_p9)   ;;  %v2128_v22 = vld [vmem:[%s2782_s5 + $0x58] sm:$0xff] (!%p485_p9)   ;;  %vm1699_vm8 = vcmask (!%p485_p9), 474112   ;;  %vm1705_vm9 = vcmask (!%p485_p9), 515072  }
  0x1a   : > { %1986 = vmatpush3.bf16.msra.mxu1 (!%p485_p9), %v723_v8  ;;  %v2126_v20 = vld [vmem:[%s2782_s5 + $0x10] sm:$0xff] (!%p485_p9)   ;;  %v2127_v21 = vld [vmem:[%s2780_s3 + $0x20] sm:$0xff] (!%p485_p9)   ;;  %v2129_v23 = vld [vmem:[%s2780_s3 + $0x68] sm:$0xff] (!%p485_p9)  }
  0x1b   : > { %1910 = vmatpush3.bf16.msra.mxu0 (!%p485_p9), %v2115_v6  ;;  %1932 = vmatprep.subr.bf16.mxu1 (!%p485_p9), %v2116_v7  ;;  %v2130_v24 = vld [vmem:[%s2782_s5 + $0x18] sm:$0xff] (!%p485_p9)   ;;  %v2131_v25 = vld [vmem:[%s2780_s3 + $0x28] sm:$0xff] (!%p485_p9)   ;;  %v2132_v26 = vld [vmem:[%s2782_s5 + $0x60] sm:$0xff] (!%p485_p9)  }
  0x1c   : > { %s2425_s28 = scalar_select %p543_p10, %s2374_s25, 1  ;;  %1911 = vmatprep.subr.bf16.mxu0 %v2117_v9  ;;  %v2133_v27 = vld [vmem:[%s2780_s3 + $0x70] sm:$0xff]   ;;  %v2134_v28 = vld [vmem:[%s2782_s5 + $0x20] sm:$0xff]   ;;  %v2136_v30 = vld [vmem:[%s2782_s5 + $0x68] sm:$0xff]  }
  0x1d   : > { %v2135_v29 = vld [vmem:[%s2780_s3 + $0x30] sm:$0xff]   ;;  %v2137_v31 = vld [vmem:[%s2780_s3 + $0x78] sm:$0xff]   ;;  %v2138_v32 = vld [vmem:[%s2782_s5 + $0x28] sm:$0xff]  }
  0x1e   : > { %s2800_s18 = smul.u32 24, %s2425_s28  ;;  %v2139_v33 = vld [vmem:[%s2780_s3 + $0x38] sm:$0xff]   ;;  %v2140_v36 = vld [vmem:[%s2782_s5 + $0x70] sm:$0xff]   ;;  %v2142_v39 = vld [vmem:[%s2782_s5 + $0x80] sm:$0xff]   ;;  %s1811_s24 = sshll.u32 %s2425_s28, 3 }
  0x1f   : > { %1912 = vmatpush3.bf16.msra.mxu0 %v2119_v11  ;;  %s2812_s20 = smul.u32 24, %s2425_s28  ;;  %v2141_v40 = vld [vmem:[%s2782_s5 + $0x30] sm:$0xff]   ;;  %v2143_v41 = vld [vmem:[%s2782_s5 + $0x78] sm:$0xff]   ;;  %v2145_v46 = vld [vmem:[%s2782_s5 + $0x88] ss:$0 sps:$4 sm:$0xff]   ;;  %s556_s26 = scalar_lea.vmem %s2779_s2, %s1811_s24 }
  0x20   : > { %s2443_s17 = scalar_lea.vmem %s2811_s30, %s2800_s18  ;;  %1913 = vmatprep.subr.bf16.mxu0 %v2121_v15  ;;  %v2144_v43 = vld [vmem:[%s2782_s5 + $0x38] sm:$0xff]   ;;  %v957_v48 = vsel %vm721_vm0, %v2145_v46, 0  ;;  %v2146_v51 = vld [vmem:[%s2784_s7] sm:$0xff]   ;;  %v2147_v52 = vld [vmem:[%s2784_s7 + $0x8] sm:$0xff]   ;;  %s540_s28 = sand.u32 1, %s2250_s22  }
  0x21   : > { %v560_v12 = vld [vmem:[%s2443_s17 + $0x10] sm:$0xff]  ;;  %v559_v34 = vld [vmem:[%s2443_s17 + $0x8] sm:$0xff]  ;;  %v558_v37 = vld [vmem:[%s2443_s17] sm:$0xff]  ;;  %s552_s23 = scalar_lea.vmem %s2813_s1, %s2812_s20  ;;  %s2264_s20 = smov 48  }
  0x22   : > { %v563_v14 = vpack.c.bf16 %v560_v12, %v560_v12  ;;  %v562_v35 = vpack.c.bf16 %v559_v34, %v559_v34  ;;  %v561_v38 = vpack.c.bf16 %v558_v37, %v558_v37  ;;  %v565_v42 = vld [vmem:[%s552_s23 + $0x8] sm:$0xff]  ;;  %v566_v44 = vld [vmem:[%s552_s23 + $0x10] sm:$0xff]  ;;  %v564_v47 = vld [vmem:[%s552_s23] sm:$0xff]  ;;  %s2061_s30 = smul.u32 40, %s540_s28 }
  0x23   : > { %1914 = vmatpush3.bf16.msra.mxu0 %v2123_v17  ;;  %v568_v45 = vpack.c.bf16 %v565_v42, %v565_v42  ;;  %v569_v49 = vpack.c.bf16 %v566_v44, %v566_v44  ;;  %v567_v50 = vpack.c.bf16 %v564_v47, %v564_v47  ;;  %v2148_v53 = vld [vmem:[%s2785_s8] sm:$0xff]   ;;  %v2149_v54 = vld [vmem:[%s2784_s7 + $0x10] sm:$0xff]   ;;  %v2150_v55 = vld [vmem:[%s2785_s8 + $0x8] sm:$0xff]   ;;  %s2063_s24 = smul.u32 640, %s2374_s25  ;;  %s1708_s25 = scalar_lea.sflag [#allocation3], %s540_s28 }
  0x24   : > { %1988 = vmatmul.mubr.msk.bf16.vlgmr.msra.gmra.mrb[0].mxu1 %vm717_vm2, %v563_v14  ;;  %1915 = vmatprep.subr.bf16.mxu0 %v2125_v19  ;;  %v2151_v56 = vld [vmem:[%s2784_s7 + $0x18] sm:$0xff]   ;;  %v2152_v57 = vld [vmem:[%s2785_s8 + $0x10] sm:$0xff]   ;;  %v2153_v58 = vld [vmem:[%s2784_s7 + $0x20] ss:$0 sps:$4 sm:$0x77]   ;;  %s542_s27 = scalar_lea.vmem [#allocation2], %s2061_s30 }
  0x25   : > { %1933 = vmatpush3.bf16.msra.mxu1 %v2118_v10  ;;  %757 = vmatprep.mubr.bf16.mxu0 %v562_v35  ;;  %v1166_v59 = vsel %vm1091_vm3, %v2153_v58, 0  ;;  %v2154_v60 = vld [vmem:[%s2785_s8 + $0x18] sm:$0xff]   ;;  %v2155_v61 = vld [vmem:[%s2785_s8 + $0x20] ss:$0 sps:$4 sm:$0x77]   ;;  %s1722_s1 = sshll.u32 %s542_s27, 4  ;;  %s2735_s1 = int_to_ptr.vmem [resolvable:$true] %s1722_s1 }
  0x26   : > { %1934 = vmatprep.subr.bf16.mxu1 %v2120_v13  ;;  %991 = vmatprep.mubr.bf16.mxu1 %v568_v45  ;;  %v1093_v62 = vsel %vm1091_vm3, %v2155_v61, 0  ;;  %v1812_v5 = vld [vmem:[%s2781_s4] ss:$0 sm:$0xff]  ;;  %v2163_v61 = vld [vmem:[%s2791_s14 + $0x4] ss:$20 sps:$4 sm:$0xff]  }
  0x27   : > { %1916 = vmatpush3.bf16.msra.mxu0 %v2127_v21  ;;  %v1832_v19 = vld [vmem:[%s2783_s6] ss:$0 sm:$0xff] }
  0x28   : > { %1917 = vmatprep.subr.bf16.mxu0 %v2129_v23  ;;  %v1318_v47 = vld [vmem:[%s2789_s12] sm:$0x7] }
  0x29   : > { %1935 = vmatpush3.bf16.msra.mxu1 %v2122_v16 }
  0x2a   : > { %1936 = vmatprep.subr.bf16.mxu1 %v2124_v18 }
  0x2b   : > { %1918 = vmatpush3.bf16.msra.mxu0 %v2131_v25 }
  0x2c   : > { %1919 = vmatprep.subr.bf16.mxu0 %v2133_v27  ;;  %v2156_v27 = vld [vmem:[%s2787_s10] sm:$0xff]  }
  0x2d   : > { %1937 = vmatpush3.bf16.msra.mxu1 %v2126_v20 }
  0x2e   : > { %1938 = vmatprep.subr.bf16.mxu1 %v2128_v22 }
  0x2f   : > { %1920 = vmatpush3.bf16.msra.mxu0 %v2135_v29  ;;  %v2157_v29 = vld [vmem:[%s2787_s10 + $0x8] sm:$0xff]  }
  0x30   : > { %1921 = vmatprep.subr.bf16.mxu0 %v2137_v31  ;;  %v2159_v31 = vld [vmem:[%s2787_s10 + $0x18] sm:$0xff]  }
  0x31   : > { %1939 = vmatpush3.bf16.msra.mxu1 %v2130_v24 }
  0x32   : > { %1940 = vmatprep.subr.bf16.mxu1 %v2132_v26 }
  0x33   : > { %1922 = vmatpush3.bf16.msra.mxu0 %v2139_v33 }
  0x34   : > { %1991 = vmatprep.subr.bf16.mxu0 %v2260_v1 }
  0x35   : > { %1941 = vmatpush3.bf16.msra.mxu1 %v2134_v28 }
  0x36   : > { %1942 = vmatprep.subr.bf16.mxu1 %v2136_v30  ;;  %758 = vmatmul.mubr.bf16.vlgmr.msra.gmra.mrb[0].mxu0 %v561_v38  ;;  %v2158_v30 = vld [vmem:[%s2787_s10 + $0x10] sm:$0xff]  }
  0x37   : > { %1992 = vmatpush3.bf16.msra.mxu0 %v2142_v39  ;;  %1995 = vmatprep.mubr.msk.bf16.mxu0 %vm2261_vm1, %v2260_v1  ;;  %v1864_v39 = vld [vmem:[%s2786_s9] ss:$0 sm:$0xff] }
  0x38   : > { %1993 = vmatprep.subr.bf16.mxu0 %v2260_v1 }
  0x39   : > { %1943 = vmatpush3.bf16.msra.mxu1 %v2138_v32  ;;  %v2160_v32 = vld [vmem:[%s2787_s10 + $0x20] ss:$0 sps:$4 sm:$0x77]  }
  0x3a   : > { %1944 = vmatprep.subr.bf16.mxu1 %v2140_v36  ;;  %v1265_v33 = vsel %vm1091_vm3, %v2160_v32, 0 }
  0x3b   : > { %1994 = vmatpush3.bf16.msra.mxu0 %v957_v48  ;;  %v2262_v48 = vmov 65535  }
  0x3c   : > { %1999 = vmatprep.subr.bf16.mxu0 %v2260_v1 }
  0x3d   : > { %1945 = vmatpush3.bf16.msra.mxu1 %v2141_v40 }
  0x3e   : > { %1946 = vmatprep.subr.bf16.mxu1 %v2143_v41  ;;  %1996 = vmatmul.mubr.msk.bf16.vlgmr.msra.gmra.mrb[4].mxu0 %vm717_vm2, %v569_v49  ;;  %v1331_v49 = vsel %vm1330_vm5, 4294967295, %v2262_v48 }
  0x3f   : > { %2009 = vmatprep.mubr.msk.bf16.mxu0 %vm2261_vm1, %v2260_v1  ;;  %2000 = vmatpush3.bf16.msra.mxu0 %v2148_v53 }
  0x40   : > { %2001 = vmatprep.subr.bf16.mxu0 %v2260_v1 }
  0x41   : > { %1947 = vmatpush3.bf16.msra.mxu1 %v2144_v43 }
  0x42   : > { %2013 = vmatprep.subr.bf16.mxu1 %v2260_v1 }
  0x43   : > { %2002 = vmatpush3.bf16.msra.mxu0 %v2150_v55 }
  0x44   : > { %992 = vmatmul.mubr.bf16.vlgmr.msra.gmra.mrb[4].mxu1 %v567_v50  ;;  %2003 = vmatprep.subr.bf16.mxu0 %v2260_v1  ;;  %v1332_v50 = vsel %vm1091_vm3, %v1331_v49, 0 }
  0x45   : > { %2023 = vmatprep.mubr.msk.bf16.mxu1 %vm2261_vm1, %v2260_v1  ;;  %2014 = vmatpush3.bf16.msra.mxu1 %v2146_v51  ;;  %v1334_v51 = vand.u32 %v1332_v50, %v1318_v47 }
  0x46   : > { %2015 = vmatprep.subr.bf16.mxu1 %v2260_v1 }
  0x47   : > { %2004 = vmatpush3.bf16.msra.mxu0 %v2152_v57 }
  0x48   : > { %2005 = vmatprep.subr.bf16.mxu0 %v2260_v1 }
  0x49   : > { %2016 = vmatpush3.bf16.msra.mxu1 %v2147_v52  ;;  %v1865_v52 = vld [vmem:[%s2788_s11] ss:$0 sm:$0xff] }
  0x4a   : > { %2017 = vmatprep.subr.bf16.mxu1 %v2260_v1 }
  0x4b   : > { %2006 = vmatpush3.bf16.msra.mxu0 %v2154_v60 }
  0x4c   : > { %2007 = vmatprep.subr.bf16.mxu0 %v2260_v1 }
  0x4d   : > { %2018 = vmatpush3.bf16.msra.mxu1 %v2149_v54 }
  0x4e   : > { %2019 = vmatprep.subr.bf16.mxu1 %v2260_v1 }
  0x4f   : > { %2008 = vmatpush3.bf16.msra.mxu0 %v1093_v62  ;;  %v2164_v62 = vld [vmem:[%s2791_s14 + $0x8] ss:$20 sps:$4 sm:$0xff]  }
  0x50   : > { %2027 = vmatprep.subr.bf16.mxu0 %v2260_v1 }
  0x51   : > { %2020 = vmatpush3.bf16.msra.mxu1 %v2151_v56 }
  0x52   : > { %2021 = vmatprep.subr.bf16.mxu1 %v2260_v1 }
  0x55   : > { %2022 = vmatpush3.bf16.msra.mxu1 %v1166_v59 }
  0x56   : > { %2041 = vmatprep.subr.bf16.mxu1 %v2260_v1 }
  0xf7   : > { %v799_v63 = vpop.f32.mrb[0].mxu1 }
  0xf8   : > { %v1989_v0 = vpop.f32.mrb[1].mxu1 }
  0xf9   : > { %v802_v2 = vpop.f32.mrb[2].mxu1  ;;  %v2172_v0 = vld [vmem:[%s2791_s14 + $0x34] ss:$20 sps:$4 sm:$0xff]  }
  0xfa   : > { %v1990_v3 = vpop.f32.mrb[3].mxu1  ;;  %v2170_v2 = vld [vmem:[%s2791_s14 + $0x30] ss:$20 sps:$4 sm:$0xff]  }
  0xfb   : > { %v2178_v3 = vld [vmem:[%s2791_s14 + $0x5c] ss:$20 sps:$4 sm:$0xff]  }
 0x109   : > { %v1923_v4 = vpop.f32.mrb[0].mxu0 }
 0x10a   : > { %v1924_v6 = vpop.f32.mrb[1].mxu0 }
 0x10b   : > { %v1925_v7 = vadd.f32 %v1924_v6, %v1923_v4  ;;  %v1926_v8 = vpop.f32.mrb[2].mxu0  ;;  %v1307_v4 = vld [vmem:[%s556_s26] sm:$0xff]  ;;  %s2267_s26 = smov [#allocation2]  }
 0x10c   : > { %v1927_v9 = vpop.f32.mrb[3].mxu0  ;;  %s2200_s18 = sshll.u32 %s2267_s26, 4  ;;  %s2201_s18 = int_to_ptr.vmem [resolvable:$false] %s2200_s18 }
 0x10d   : > { %v760_v10 = vadd.f32 %v1925_v7, %v1812_v5  ;;  %v2176_v5 = vld [vmem:[%s2791_s14 + $0x58] ss:$20 sps:$4 sm:$0xff]   ;;  %s2202_s23 = scalar_lea.vmem %s2201_s18, 1280  ;;  %p2203_p0 = scmp.lt.s32.totalorder %s2735_s1, %s2201_s18 }
 0x10e   : > { %v2184_v7 = vld [vmem:[%s2791_s14 + $0x84] ss:$20 sps:$4 sm:$0xff]  }
 0x10f   : > { %v800_v11 = vadd.f32 %v799_v63, %v760_v10  ;;  %v2166_v63 = vld [vmem:[%s2791_s14 + $0xc] ss:$20 sps:$4 sm:$0xff]  }
 0x110   : > { %v2182_v10 = vld [vmem:[%s2791_s14 + $0x80] ss:$20 sps:$4 sm:$0xff]  }
 0x111   : > { %v805_v12 = vmax.f32 %v800_v11, 0.0  ;;  %v1033_v13 = vpop.f32.mrb[4].mxu0  ;;  %v2161_v11 = vld [vmem:[%s2791_s14] ss:$20 sps:$4 sm:$0xff]  }
 0x112   : > { %v1997_v14 = vpop.f32.mrb[5].mxu0 }
 0x113   : > { %v1040_v15 = vpack.c.bf16 %v805_v12, %v805_v12  ;;  %v1036_v17 = vpop.f32.mrb[6].mxu0  ;;  %v2167_v14 = vld [vmem:[%s2791_s14 + $0x28] ss:$20 sps:$4 sm:$0xff]  }
 0x114   : > { %v1998_v20 = vpop.f32.mrb[7].mxu0  ;;  %v2181_v17 = vld [vmem:[%s2791_s14 + $0x7c] ss:$20 sps:$4 sm:$0xff]  }
 0x115   : > { %2024 = vmatmul.mubr.msk.bf16.vlgmr.msra.gmra.mrb[8].mxu1 %vm1087_vm4, %v1040_v15  ;;  %v2175_v15 = vld [vmem:[%s2791_s14 + $0x54] ss:$20 sps:$4 sm:$0xff]  }
 0x116   : > { %2043 = vmatprep.mubr.msk.bf16.mxu1 %vm2261_vm1, %v2260_v1  ;;  %2042 = vmatpush3.bf16.msra.mxu1 %v1334_v51 }
 0x117   : > { %v1948_v16 = vpop.f32.mrb[4].mxu1  ;;  %1567 = vmatprep.subr.bf16.mxu1 %v2163_v61 }
 0x118   : > { %v1949_v18 = vpop.f32.mrb[5].mxu1 }
 0x119   : > { %v1950_v21 = vadd.f32 %v1949_v18, %v1948_v16  ;;  %v1951_v22 = vpop.f32.mrb[6].mxu1  ;;  %v2173_v16 = vld [vmem:[%s2791_s14 + $0x50] ss:$20 sps:$4 sm:$0xff]   ;;  %v2179_v18 = vld [vmem:[%s2791_s14 + $0x78] ss:$20 sps:$4 sm:$0xff]  }
 0x11a   : > { %v1952_v23 = vpop.f32.mrb[7].mxu1  ;;  %v1403_v22 = vld [vmem:[%s2791_s14 + $0xa8] sm:$0x77] }
 0x11b   : > { %v994_v24 = vadd.f32 %v1950_v21, %v1832_v19  ;;  %v1402_v19 = vld [vmem:[%s2791_s14 + $0xa0] sm:$0x77]  ;;  %v1897_v23 = vcombine.high %v1403_v22, %v1403_v22 }
 0x11c   : > { %v1895_v20 = vcombine.high %v1402_v19, %v1402_v19  ;;  %v1894_v21 = vcombine.low %v1402_v19, %v1402_v19 }
 0x11d   : > { %v1034_v25 = vadd.f32 %v1033_v13, %v994_v24  ;;  %v2169_v13 = vld [vmem:[%s2791_s14 + $0x2c] ss:$20 sps:$4 sm:$0xff]   ;;  %v1896_v24 = vcombine.low %v1403_v22, %v1403_v22 }
 0x11f   : > { %v1039_v26 = vmax.f32 %v1034_v25, 0.0  ;;  %v1553_v25 = vsel %vm1091_vm3, %v1894_v21, 0 }
 0x121   : > { %v1050_v28 = vpack.c.bf16 %v1039_v26, %v1039_v26  ;;  %v1559_v26 = vsel %vm1091_vm3, %v1896_v24, 0 }
 0x123   : > { %2010 = vmatmul.mubr.msk.bf16.vlgmr.msra.gmra.mrb[8].mxu0 %vm1087_vm4, %v1050_v28  ;;  %v1872_v28 = vld [vmem:[%s2790_s13] ss:$0 sm:$0xff] }
 0x124   : > { %2028 = vmatpush3.bf16.msra.mxu0 %v2156_v27  ;;  %2037 = vmatprep.mubr.msk.bf16.mxu0 %vm2261_vm1, %v2260_v1  ;;  %v2266_v27 = vmov 0  }
 0x125   : > { %2029 = vmatprep.subr.bf16.mxu0 %v2260_v1 }
 0x128   : > { %2030 = vmatpush3.bf16.msra.mxu0 %v2157_v29 }
 0x129   : > { %2031 = vmatprep.subr.bf16.mxu0 %v2260_v1 }
 0x12c   : > { %2032 = vmatpush3.bf16.msra.mxu0 %v2158_v30 }
 0x12d   : > { %2033 = vmatprep.subr.bf16.mxu0 %v2260_v1 }
 0x130   : > { %2034 = vmatpush3.bf16.msra.mxu0 %v2159_v31 }
 0x131   : > { %2035 = vmatprep.subr.bf16.mxu0 %v2260_v1 }
 0x134   : > { %2036 = vmatpush3.bf16.msra.mxu0 %v1265_v33 }
 0x135   : > { %1608 = vmatprep.subr.bf16.mxu0 %v2166_v63 }
 0x1e8   : > { %v1202_v34 = vpop.f32.mrb[8].mxu1 }
 0x1e9   : > { %v2025_v35 = vpop.f32.mrb[9].mxu1 }
 0x1ea   : > { %v1205_v36 = vpop.f32.mrb[10].mxu1  ;;  %v2189_v35 = vld [vmem:[%s2791_s14 + $0x10] ss:$20 sps:$4 sm:$0xff]  }
 0x1eb   : > { %v2026_v37 = vpop.f32.mrb[11].mxu1 }
 0x1ec   : > { %v2190_v37 = vld [vmem:[%s2791_s14 + $0x38] ss:$20 sps:$4 sm:$0xff]  }
 0x1f6   : > { %v1129_v38 = vpop.f32.mrb[8].mxu0 }
 0x1f7   : > { %v1203_v40 = vadd.f32 %v1202_v34, %v1129_v38  ;;  %v2011_v41 = vpop.f32.mrb[9].mxu0  ;;  %v2191_v38 = vld [vmem:[%s2791_s14 + $0x60] ss:$20 sps:$4 sm:$0xff]  }
 0x1f8   : > { %v1132_v42 = vpop.f32.mrb[10].mxu0 }
 0x1f9   : > { %v1215_v43 = vadd.f32 %v1864_v39, %v1203_v40  ;;  %v2012_v44 = vpop.f32.mrb[11].mxu0  ;;  %v2192_v39 = vld [vmem:[%s2791_s14 + $0x88] ss:$20 sps:$4 sm:$0xff]   ;;  %v2193_v40 = vld [vmem:[%s2791_s14 + $0xb0] ss:$0 sps:$4 sm:$0x77]   ;;  %v1407_v42 = vlaneseq }
 0x1fa   : > { %v1565_v41 = vsel %vm1091_vm3, %v2193_v40, 0 }
 0x1fb   : > { %v1216_v45 = vmax.f32 %v1215_v43, 0.0  ;;  %v1408_v43 = vshrl.u32 %v1407_v42, 7 }
 0x1fd   : > { %v1217_v46 = vpack.c.bf16 %v1216_v45, %v1216_v45  ;;  %v1409_v44 = vsub.s32 0, %v1408_v43  ;;  %v1417_v45 = vsub.s32 2, %v1408_v43  ;;  %v1413_v47 = vsub.s32 1, %v1408_v43 }
 0x1fe   : > { %v1421_v48 = vsub.s32 3, %v1408_v43 }
 0x1ff   : > { %2038 = vmatmul.mubr.msk.bf16.vlgmr.msra.gmra.mrb[12].mxu0 %vm1087_vm4, %v1217_v46  ;;  %v1405_v46 = vld [vmem:[%s2792_s15] sm:$0x1f] }
 0x200   : > { %1609 = vmatpush1.bf16.msra.mxu0 %v2164_v62  ;;  %1640 = vmatprep.mubr.bf16.mxu0 %v2266_v27  ;;  %v1410_v49 = vrot.slane %v1405_v46, %v1409_v44  ;;  %v1414_v50 = vrot.slane %v1405_v46, %v1413_v47  ;;  %v1422_v51 = vrot.slane %v1405_v46, %v1421_v48 }
 0x201   : > { %1610 = vmatprep.subr.bf16.mxu0 %v2172_v0  ;;  %v1425_v0 = vsub.s32 4, %v1408_v43 }
 0x204   : > { %1611 = vmatpush1.bf16.msra.mxu0 %v2170_v2  ;;  %v1426_v2 = vrot.slane %v1405_v46, %v1425_v0 }
 0x205   : > { %1612 = vmatprep.subr.bf16.mxu0 %v2178_v3 }
 0x208   : > { %1613 = vmatpush1.bf16.msra.mxu0 %v2176_v5 }
 0x209   : > { %1614 = vmatprep.subr.bf16.mxu0 %v2184_v7 }
 0x20c   : > { %1615 = vmatpush1.bf16.msra.mxu0 %v2182_v10 }
 0x20d   : > { %1901 = vmatprep.subr.msk.bf16.mxu0 %vm1091_vm3, %v1897_v23 }
 0x210   : > { %1617 = vmatpush1.bf16.msra.mxu0 %v1559_v26 }
 0x2d2   : > { %v1301_v53 = vpop.f32.mrb[12].mxu0 }
 0x2d3   : > { %v1302_v54 = vadd.f32 %v1865_v52, %v1301_v53  ;;  %v2039_v55 = vpop.f32.mrb[13].mxu0 }
 0x2d4   : > { %v1304_v56 = vpop.f32.mrb[14].mxu0 }
 0x2d5   : > { %v1308_v57 = vmul.f32 0.5, %v1302_v54  ;;  %v2040_v58 = vpop.f32.mrb[15].mxu0 }
 0x2d7   : > { %v1309_v59 = vmul.f32 1.442695, %v1308_v57 }
 0x2d9   : > { %2194 = vpow2.f32 %v1309_v59 }
 0x2e3   : > { %v2195_v60 = vpop.eup %2194 }
 0x2e4   : > { %1312 = vrot.lane.b32.xlu0 %v2195_v60, %s2263_s19  ;;  %s2733_s19 = scalar_lea.hbm %s2793_s16, %s2063_s24 }
 0x2e8   : > { %1690 = vrot.lane.b32.xlu0 %v1302_v54, %s2264_s20  ;;  %s2265_s20 = smov 58  }
 0x356   : > { %v1313_v6 = vpop.permute.xlu0 %1312 }
 0x357   : > { %v1315_v8 = vmul.f32 %v1313_v6, %v1307_v4 }
 0x359   : > { %v1316_v9 = vadd.f32 %v1315_v8, %v1302_v54 }
 0x35a   : > { %v1691_v6 = vpop.permute.xlu0 %1690 }
 0x35b   : > { %1694 = vrot.lane.b32.xlu1 %v1316_v9, %s2265_s20  ;;  %v1317_v12 = vpack.c.bf16 %v1316_v9, %v1316_v9  ;;  %s2196_s20 = scalar_lea.vmem %s2735_s1, 640 }
 0x35c   : > { %p2197_p11 = scmp.ne.s32.totalorder %s2735_s1, %s2196_s20  ;;  %p2204_p1 = scmp.lt.s32.totalorder %s2202_s23, %s2196_s20 }
 0x35d   : > { %2044 = vmatmul.mubr.msk.bf16.vlgmr.msra.gmra.mrb[12].mxu1 %vm1326_vm6, %v1317_v12 }
 0x35e   : > { %1568 = vmatpush1.bf16.msra.mxu1 %v2161_v11  ;;  %1599 = vmatprep.mubr.bf16.mxu1 %v2266_v27  ;;  %p2198_p12 = pnand %p2197_p11, %p2391_p5  ;;  %p2205_p2 = por %p2204_p1, %p2203_p0 }
 0x35f   : > { %1569 = vmatprep.subr.bf16.mxu1 %v2169_v13 }
 0x360   : > { %p2199_p13 = pneg %p2198_p12 }
 0x362   : > { %1570 = vmatpush1.bf16.msra.mxu1 %v2167_v14  ;;  %p2206_p3 = pnand %p2205_p2, %p2199_p13 }
 0x363   : > { %1571 = vmatprep.subr.bf16.mxu1 %v2175_v15 }
 0x366   : > { %1572 = vmatpush1.bf16.msra.mxu1 %v2173_v16 }
 0x367   : > { %1573 = vmatprep.subr.bf16.mxu1 %v2181_v17 }
 0x36a   : > { %1574 = vmatpush1.bf16.msra.mxu1 %v2179_v18 }
 0x36b   : > { %1899 = vmatprep.subr.msk.bf16.mxu1 %vm1091_vm3, %v1895_v20 }
 0x36e   : > { %1576 = vmatpush1.bf16.msra.mxu1 %v1553_v25 }
 0x36f   : > { %2047 = vmatprep.subr.bf16.mxu1 %v2260_v1 }
 0x3cd   : > { %v1695_v8 = vpop.permute.xlu1 %1694 }
 0x430   : > { %v1370_v29 = vpop.f32.mrb[12].mxu1 }
 0x431   : > { %v1371_v30 = vadd.f32 %v1872_v28, %v1370_v29  ;;  %v2045_v31 = vpop.f32.mrb[13].mxu1 }
 0x432   : > { %v1373_v32 = vpop.f32.mrb[14].mxu1 }
 0x433   : > { %v1376_v33 = vmax.f32 %v1371_v30, 0.0  ;;  %v2046_v34 = vpop.f32.mrb[15].mxu1 }
 0x435   : > { %v1377_v36 = vpack.c.bf16 %v1376_v33, %v1376_v33 }
 0x437   : > { %1900 = vmatmul.mubr.msk.bf16.vlgmr.msra.gmra.mrb[16].mxu1 %vm1087_vm4, %v1377_v36  ;;  %1902 = vmatmul.mubr.msk.bf16.vlgmr.msra.gmra.mrb[16].mxu0 %vm1087_vm4, %v1377_v36 }
 0x438   : > { %2048 = vmatpush3.bf16.msra.mxu1 %v2189_v35  ;;  %2057 = vmatprep.mubr.msk.bf16.mxu1 %vm2261_vm1, %v2260_v1 }
 0x439   : > { %2049 = vmatprep.subr.bf16.mxu1 %v2260_v1 }
 0x43c   : > { %2050 = vmatpush3.bf16.msra.mxu1 %v2190_v37 }
 0x43d   : > { %2051 = vmatprep.subr.bf16.mxu1 %v2260_v1 }
 0x440   : > { %2052 = vmatpush3.bf16.msra.mxu1 %v2191_v38 }
 0x441   : > { %2053 = vmatprep.subr.bf16.mxu1 %v2260_v1 }
 0x444   : > { %2054 = vmatpush3.bf16.msra.mxu1 %v2192_v39 }
 0x445   : > { %2055 = vmatprep.subr.bf16.mxu1 %v2260_v1  ;;  %v1418_v1 = vrot.slane %v1405_v46, %v1417_v45 }
 0x448   : > { %2056 = vmatpush3.bf16.msra.mxu1 %v1565_v41 }
 0x44b   : > { %2058 = vmatmul.mubr.msk.bf16.vlgmr.msra.gmra.mrb[20].mxu1 %vm1087_vm4, %v1377_v36 }
 0x50a   : > { %v1601_v52 = vpop.f32.mrb[16].mxu1  ;;  %v1642_v53 = vpop.f32.mrb[16].mxu0 }
 0x50b   : > { %v1602_v54 = vadd.f32 %v1601_v52, %v1410_v49  ;;  %v1643_v55 = vadd.f32 %v1642_v53, %v1418_v1  ;;  %v1603_v56 = vpop.f32.mrb[17].mxu1  ;;  %v1644_v57 = vpop.f32.mrb[17].mxu0 }
 0x50c   : > { %v1604_v58 = vadd.f32 %v1603_v56, %v1414_v50  ;;  %v1645_v59 = vadd.f32 %v1644_v57, %v1422_v51  ;;  %v1605_v60 = vpop.f32.mrb[18].mxu1  ;;  %v1646_v61 = vpop.f32.mrb[18].mxu0 }
 0x50d   : > { %1701 = vst [vmem:[%s542_s27] sm:$0xff] %v1602_v54  ;;  %1703 = vst [vmem:[%s542_s27 + $0x10] sm:$0xff] %v1643_v55  ;;  %v1606_v62 = vpop.f32.mrb[19].mxu1  ;;  %v1647_v63 = vpop.f32.mrb[19].mxu0 }
 0x50e   : > { %1702 = vst [vmem:[%s542_s27 + $0x8] sm:$0xff] %v1604_v58  ;;  %1704 = vst [vmem:[%s542_s27 + $0x18] sm:$0xff] %v1645_v59 }
 0x51e   : > { %v1683_v3 = vpop.f32.mrb[20].mxu1 }
 0x51f   : > { %v1684_v4 = vadd.f32 %v1683_v3, %v1426_v2  ;;  %v2059_v5 = vpop.f32.mrb[21].mxu1 }
 0x520   : > { %v1686_v7 = vpop.f32.mrb[22].mxu1 }
 0x521   : > { %v1698_v9 = vsel %vm1697_vm7, %v1684_v4, %v1691_v6  ;;  %v2060_v10 = vpop.f32.mrb[23].mxu1 }
 0x522   : > { %v1700_v11 = vsel %vm1699_vm8, %v1698_v9, %v1695_v8 }
 0x523   : > { %1706 = vst.msk [vmem:[%s542_s27 + $0x20] sm:$0xff] %vm1705_vm9, %v1700_v11 }
 0x524   : > { %2209 = shalt.err (!%p2206_p3)
}
 0x525   : > { %s2210_s28 = scalar_lea.hbm %s2733_s19, 640  ;;  %s2214_s27 = scalar_lea.hbm %s2793_s16, 1280 }
 0x526   : > { %p2211_p4 = scmp.ne.s32.totalorder %s2733_s19, %s2210_s28  ;;  %p2215_p9 = scmp.lt.u32.totalorder %s2733_s19, %s2793_s16 }
 0x527   : > { %p2216_p10 = scmp.lt.u32.totalorder %s2214_s27, %s2210_s28  ;;  %p2218_p12 = scmp.lt.u32.totalorder %s2210_s28, %s2733_s19 }
 0x528   : > { %p2212_p7 = pnand %p2211_p4, %p2391_p5 }
 0x529   : > { %p2217_p11 = por %p2216_p10, %p2215_p9 }
 0x52a   : > { %p2213_p8 = pneg %p2212_p7 }
 0x52b   : > { %p2219_p13 = por %p2218_p12, %p2217_p11 }
 0x52d   : > { %p2220_p0 = pnand %p2219_p13, %p2213_p8 }
 0x52f   : > { %2223 = shalt.err (!%p2220_p0)
}
 0x530   : > { %2064 = dma.vmem_to_hbm [thread:$0]  (%p2391_p5), %s2735_s1, 640, %s2733_s19, %s1708_s25  }
 0x531 PF: > { %s2814_s29 = sld [smem:[#allocation7_spill]]  ;;  %s2815_s20 = sld [smem:[#allocation5_spill]] }
 0x537   : > { %p2070_p1 = scmp.ge.s32.totalorder %s2814_s29, 2  ;;  %s1734_s18 = sand.u32 1, %s2815_s20  }
 0x538   : > { %s1735_s23 = scalar_lea.sflag [#allocation3], %s1734_s18 }
 0x539   : > { %p2067_p2 = pnand %p2070_p1, %p2395_p6 }
 0x53b   : > { %2241 = dma.done.wait (!%p2067_p2), %s1735_s23, 640  }
 0x53c   : > { %2243 = vsyncadd (!%p2067_p2), %s1735_s23, 4294966656  ;;  %s2817_s24 = sld [smem:[#allocation8_spill]]  ;;  %s2818_s28 = sld [smem:[#allocation6_spill]] }
 0x53d   : > { %s2819_s23 = sld [smem:[#allocation9_spill]]  ;;  %s2820_s21 = smov %s2250_s22 }
 0x542   : > { %p26_p3 = scmp.ge.s32.totalorder %s2817_s24, 4   ;;  %s2821_s22 = smov %s2818_s28 }
 0x544   :  { %28 = sbr.rel (!%p26_p3) target bundleno = 6 (0x6), region = 125 }
 0x54b   :  { %1740 = vsyncpa [#allocation3], 1 }
 0x54c   :  { %1742 = vsyncpa [#allocation3 + $0x1], 1 }

</bundles_post_ra>
